<compile_context>
chip_gen: v5e
topology: v5e:2x2
jax: 0.10.0
libtpu: 0.0.40
codegen_flags: <defaults>
</compile_context>

<pallas_src>
import jax
import jax.numpy as jnp
from jax.experimental import pallas as pl
from jax.experimental.pallas import tpu as pltpu

block_size = 8
n_embed = 32

_TM = 512                     # token-tile rows for the gridded path (large tiles
                              # amortize the ~0.35us/step pipeline overhead)
_BF16_MAC_THRESHOLD = 1 << 22 # switch MXU operands to bf16 only once the matmul
                              # work actually dominates launch/DMA overhead


def _ff_kernel(x_ref, wt_ref, b_ref, o_ref):
    """out = relu(x @ wt + b); wt is the pre-transposed nn.Linear weight."""
    # Native A@B contraction on the MXU; accumulate in f32 regardless of the
    # operand dtype (f32 or bf16).
    y = jnp.dot(x_ref[...], wt_ref[...], preferred_element_type=jnp.float32)
    y = y + b_ref[...]                                   # bias-add on f32 accumulator
    o_ref[...] = jnp.maximum(y, 0.0).astype(o_ref.dtype)  # fused ReLU, cast on store


def feedforward(x, w, b, *, tm=_TM, use_bf16=None):
    """x: (B, T, C); w: (C, C) nn.Linear weight (out_features, in_features);
    b: (C,) bias. Returns relu(x @ w.T + b) with shape (B, T, C)."""
    B, T, C = x.shape
    BT = B * T
    out_dtype = x.dtype

    x2 = x.reshape(BT, C)                       # lane-dense flatten, no data movement
    wt = jnp.transpose(w)                       # pre-transpose once in the wrapper
    b2 = b.reshape(1, C).astype(jnp.float32)    # bias stays f32 (added to f32 acc)

    if use_bf16 is None:
        use_bf16 = (BT * C * C) >= _BF16_MAC_THRESHOLD
    if use_bf16:
        x2 = x2.astype(jnp.bfloat16)
        wt = wt.astype(jnp.bfloat16)

    if BT >= 2 * tm and BT % tm == 0:
        # Gridded path: tile the token (M) dimension, keep W and bias resident
        # (constant index_map => fetched once), mark the axis parallel so the
        # two TensorCores on v7x both get work.
        out2 = pl.pallas_call(
            _ff_kernel,
            out_shape=jax.ShapeDtypeStruct((BT, C), out_dtype),
            grid=(BT // tm,),
            in_specs=[
                pl.BlockSpec((tm, C), lambda i: (i, 0)),
                pl.BlockSpec((C, C), lambda i: (0, 0)),
                pl.BlockSpec((1, C), lambda i: (0, 0)),
            ],
            out_specs=pl.BlockSpec((tm, C), lambda i: (i, 0)),
            compiler_params=pltpu.CompilerParams(
                dimension_semantics=("parallel",),
                vmem_limit_bytes=32 << 20,   # covers v5e's 16 MiB scoped default
            ),
        )(x2, wt, b2)
    else:
        # Small-problem path: one invocation, no grid — at (16, 32) everything
        # fits in one step and a grid would be pure launch/DMA overhead.
        out2 = pl.pallas_call(
            _ff_kernel,
            out_shape=jax.ShapeDtypeStruct((BT, C), out_dtype),
            in_specs=[
                pl.BlockSpec((BT, C), lambda: (0, 0)),
                pl.BlockSpec((C, C), lambda: (0, 0)),
                pl.BlockSpec((1, C), lambda: (0, 0)),
            ],
            out_specs=pl.BlockSpec((BT, C), lambda: (0, 0)),
        )(x2, wt, b2)

    return out2.reshape(B, T, C)   # layout-free reshape back to (B, T, C)


def _reference(x, w, b):
    """Pure-JAX mirror of the PyTorch forward: relu(linear(x))."""
    return jnp.maximum(x @ w.T + b, 0.0)


if __name__ == "__main__":
    key = jax.random.PRNGKey(0)
    kx, kw, kb, kx2 = jax.random.split(key, 4)
    B, T, C = 2, block_size, n_embed

    # Deterministic synthetic parameters with nn.Linear-style uniform bounds.
    bound = 1.0 / (C ** 0.5)
    w = jax.random.uniform(kw, (C, C), minval=-bound, maxval=bound,
                           dtype=jnp.float32)
    b = jax.random.uniform(kb, (C,), minval=-bound, maxval=bound,
                           dtype=jnp.float32)

    # 1) Module-sized problem (B=2, T=8, C=32): exercises the single-shot path.
    x_small = jax.random.normal(kx, (B, T, C), dtype=jnp.float32)
    out_small = jax.block_until_ready(feedforward(x_small, w, b))
    ref_small = _reference(x_small, w, b)
    assert out_small.shape == (B, T, C), out_small.shape
    assert jnp.allclose(out_small, ref_small, atol=1e-5, rtol=1e-5), \
        "small-path mismatch vs reference"

    # 2) Larger token batch (B=128 -> B*T=1024): exercises the gridded,
    #    resident-weight, parallel-axis path (still f32 at this size).
    Bl = 128
    x_large = jax.random.normal(kx2, (Bl, T, C), dtype=jnp.float32)
    out_large = jax.block_until_ready(feedforward(x_large, w, b))
    ref_large = _reference(x_large, w, b)
    assert out_large.shape == (Bl, T, C), out_large.shape
    assert jnp.allclose(out_large, ref_large, atol=1e-5, rtol=1e-5), \
        "gridded-path mismatch vs reference"

    print("KERNEL_OK")
</pallas_src>

<mosaic_0001>
module attributes {stable_mosaic.version = 11 : i64} {
  func.func @_ff_kernel(%arg0: memref<16x32xf32, #tpu.memory_space<vmem>>, %arg1: memref<32x32xf32, #tpu.memory_space<vmem>>, %arg2: memref<1x32xf32, #tpu.memory_space<vmem>>, %arg3: memref<16x32xf32, #tpu.memory_space<vmem>>) attributes {dimension_semantics = [], scalar_prefetch = 0 : i64, scratch_operands = 0 : i64, tpu.core_type = #tpu.core_type<tc>} {
    %c0 = arith.constant 0 : index
    %c0_0 = arith.constant 0 : index
    %0 = vector.load %arg0[%c0, %c0_0] : memref<16x32xf32, #tpu.memory_space<vmem>>, vector<16x32xf32>
    %c0_1 = arith.constant 0 : index
    %c0_2 = arith.constant 0 : index
    %1 = vector.load %arg1[%c0_1, %c0_2] : memref<32x32xf32, #tpu.memory_space<vmem>>, vector<32x32xf32>
    %cst = arith.constant dense<0.000000e+00> : vector<16x32xf32>
    %2 = tpu.matmul %0, %1, %cst {dimension_numbers = #tpu.dot_dimension_numbers<[1], [0], [0], [1], [0, 0, 1, 1], [], []>} : vector<16x32xf32>, vector<32x32xf32>, vector<16x32xf32> -> vector<16x32xf32>
    %c0_3 = arith.constant 0 : index
    %c0_4 = arith.constant 0 : index
    %3 = vector.load %arg2[%c0_3, %c0_4] : memref<1x32xf32, #tpu.memory_space<vmem>>, vector<1x32xf32>
    %4 = vector.broadcast %3 : vector<1x32xf32> to vector<16x32xf32>
    %5 = arith.addf %2, %4 : vector<16x32xf32>
    %cst_5 = arith.constant 0.000000e+00 : f32
    %6 = vector.broadcast %cst_5 : f32 to vector<16x32xf32>
    %7 = arith.maximumf %5, %6 : vector<16x32xf32>
    %c0_6 = arith.constant 0 : index
    %c0_7 = arith.constant 0 : index
    %8 = vector.load %arg3[%c0_6, %c0_7] : memref<16x32xf32, #tpu.memory_space<vmem>>, vector<16x32xf32>
    tpu.vector_store %arg3[%c0_6, %c0_7], %7 {strides = array<i32>} : memref<16x32xf32, #tpu.memory_space<vmem>>, vector<16x32xf32>,
    return
  }
}

</mosaic_0001>

<bundles_post_ra>
// kernel: tpu_custom_call.1
= control target key start
LH: loop header
LB: loop body
LE: loop exit
PB: predicated region body
PF: predicated region fallthrough
CT: control target
= control target key end

     0   :  { %8 = vsyncpa [#allocation3], 0  ;;  %s251_s0 = inlined_call_operand.hbm [shape: f32[16,32], index: 0, kind: input, shape index: {}]   ;;  %s252_s1 = inlined_call_operand.hbm [shape: f32[32,32], index: 1, kind: input, shape index: {}]   ;;  %s253_s2 = inlined_call_operand.vmem [shape: f32[1,32], index: 2, kind: input, shape index: {}]   ;;  %s254_s3 = inlined_call_operand.hbm [shape: f32[16,32], index: 3, kind: output, shape index: {}]  }
   0x1   :  { %9 = vsyncpa [#allocation6], 0 }
   0x2   :  { %10 = vsyncpa [#allocation4], 0  ;;  %s15_s14 = sshll.u32 %s251_s0, 4  ;;  %s201_s15 = smov [#allocation2]   ;;  %s16_s14 = int_to_ptr.hbm [resolvable:$true] %s15_s14 }
   0x3   :  { %s17_s16 = sshll.u32 %s201_s15, 4  ;;  %s28_s19 = sshll.u32 %s252_s1, 4  ;;  %s18_s16 = int_to_ptr.vmem [resolvable:$true] %s17_s16  ;;  %s29_s19 = int_to_ptr.hbm [resolvable:$true] %s28_s19 }
   0x4   :  { %s202_s20 = smov 128   ;;  %s203_s21 = smov 8  }
   0x5   :  { %23 = dma.hbm_to_vmem [thread:$0]  %s16_s14, 256, %s18_s16, [#allocation3], %s202_s20, %s202_s20, %s203_s21  }
   0x6   :  { %s204_s22 = smov [#allocation5]  }
   0x7   :  { %s30_s23 = sshll.u32 %s204_s22, 4  ;;  %s31_s23 = int_to_ptr.vmem [resolvable:$true] %s30_s23 }
   0x8   :  { %36 = dma.hbm_to_vmem [thread:$0]  %s29_s19, 512, %s31_s23, [#allocation6], %s202_s20, %s202_s20, %s203_s21  }
   0x9   :  { %195 = dma.done.wait [#allocation3], 256  }
   0xa   :  { %196 = vsyncadd [#allocation3], 4294967040 }
   0xb   :  { %197 = dma.done.wait [#allocation6], 512  }
   0xc   :  { %198 = vsyncadd [#allocation6], 4294966784  ;;  %v52_v0 = vld [vmem:[#allocation5 + $0x18] sm:$0xff]  ;;  %v51_v1 = vld [vmem:[#allocation5 + $0x10] sm:$0xff]  ;;  %vm57_vm0 = vcmask 261120   ;;  %s205_s24 = smov [#allocation7]  }
   0xd   :  { %76 = vmatpush.msra.mxu0 %v52_v0  ;;  %113 = vmatpush.msra.mxu1 %v52_v0  ;;  %v50_v2 = vld [vmem:[#allocation5 + $0x8] sm:$0xff]  ;;  %v49_v3 = vld [vmem:[#allocation5] sm:$0xff]  ;;  %v47_v4 = vld [vmem:[#allocation2] sm:$0xff]  ;;  %s95_s25 = sshll.u32 %s205_s24, 4  ;;  %s97_s28 = sshll.u32 %s254_s3, 4  ;;  %s96_s25 = int_to_ptr.vmem [resolvable:$true] %s95_s25  ;;  %s98_s28 = int_to_ptr.hbm [resolvable:$true] %s97_s28 }
   0xe   :  { %v48_v5 = vld [vmem:[#allocation2 + $0x8] sm:$0xff]  ;;  %v122_v6 = vld [vmem:[%s253_s2] ss:$0 sm:$0xff] }
   0xf   :  { %77 = vmatpush.msra.mxu0 %v51_v1  ;;  %114 = vmatpush.msra.mxu1 %v51_v1 }
  0x11   :  { %78 = vmatpush.msra.mxu0 %v50_v2  ;;  %115 = vmatpush.msra.mxu1 %v50_v2 }
  0x13   :  { %79 = vmatpush.msra.mxu0 %v49_v3  ;;  %116 = vmatpush.msra.mxu1 %v49_v3 }
  0x14   :  { %111 = vmatmul.msk.f32.vlgmr.msra.gmra.mxu0 %vm57_vm0, %v47_v4  ;;  %112 = vmatmul.msk.f32.vlgmr.msra.gmra.mxu1 %vm57_vm0, %v48_v5 }
  0x91   :  { %v81_v7 = vpop.f32.mrf.mxu0  ;;  %v84_v8 = vpop.f32.mrf.mxu1 }
  0x92   :  { %v82_v9 = vadd.f32 %v122_v6, %v81_v7  ;;  %v85_v10 = vadd.f32 %v122_v6, %v84_v8 }
  0x94   :  { %v87_v11 = vmax.f32 %v82_v9, 0.0  ;;  %v88_v12 = vmax.f32 %v85_v10, 0.0 }
  0x96   :  { %89 = vst.msk [vmem:[#allocation7] sm:$0xff] %vm57_vm0, %v87_v11 }
  0x97   :  { %90 = vst.msk [vmem:[#allocation7 + $0x8] sm:$0xff] %vm57_vm0, %v88_v12 }
  0x98   :  { %103 = dma.vmem_to_hbm [thread:$0]  %s96_s25, 256, %s98_s28, [#allocation4], %s202_s20, %s202_s20, %s203_s21  }
  0x99   :  { %199 = dma.done.wait [#allocation4], 256  }
  0x9a   :  { %200 = vsyncadd [#allocation4], 4294967040 }
  0x9b   :  { %108 = vsyncpa [#allocation3], 1 }
  0x9c   :  { %109 = vsyncpa [#allocation6], 1 }
  0x9d   :  { %110 = vsyncpa [#allocation4], 1 }

</bundles_post_ra>
